<compile_context>
chip_gen: v5e
topology: v5e:2x2
jax: 0.10.0
libtpu: 0.0.40
codegen_flags: <defaults>
</compile_context>

<pallas_src>
import functools

import jax
import jax.numpy as jnp
from jax.experimental import pallas as pl
from jax.experimental.pallas import tpu as pltpu


def dqn_vrp_kernel(x_ref,
                   w1_ref, b1_ref,
                   w2_ref, b2_ref,
                   w3_ref, b3_ref,
                   w4_ref, b4_ref,
                   w5_ref, b5_ref,
                   out_ref,
                   *, act_dtype=jnp.float32):
    def layer(h, w_ref, b_ref):
        # MXU matmul with f32 accumulation; bias is a lane-dense (1, out) row.
        y = jnp.dot(h, w_ref[...], preferred_element_type=jnp.float32) + b_ref[...]
        # Optionally run tanh in bf16 (v6e/v7x EUP/VPU have bf16 paths).
        return jnp.tanh(y.astype(act_dtype))

    h = x_ref[...]
    h = layer(h, w1_ref, b1_ref)   # input_dim -> 128
    h = layer(h, w2_ref, b2_ref)   # 128 -> 64
    h = layer(h, w3_ref, b3_ref)   # 64 -> 32
    h = layer(h, w4_ref, b4_ref)   # 32 -> 8

    # fc5: (tb, 8) x (8, 1) is <1% of an MXU pass but would still pay the MXU
    # round trip -> do it as a VPU broadcast-multiply + lane reduce instead.
    h = h.astype(jnp.float32)
    y = jnp.sum(h * w5_ref[...], axis=-1, keepdims=True) + b5_ref[...]
    out_ref[...] = y.astype(out_ref.dtype)


def dqn_vrp_forward(x, params, *, block_b=512, bf16_activations=False):
    """x: (B, input_dim) float32. params: dict W1..W5 (in,out), b1..b5 (out,)."""
    x = jnp.asarray(x, jnp.float32)
    B, D = x.shape

    # Host-side repacking: biases as (1, out) lane-dense rows; W5 as a (1, 8)
    # row so the 8->1 head is a lane reduce rather than an MXU matmul.
    w1, w2, w3, w4 = params["W1"], params["W2"], params["W3"], params["W4"]
    b1, b2, b3, b4, b5 = (params[f"b{i}"].reshape(1, -1) for i in range(1, 6))
    w5_row = params["W5"].reshape(1, -1)  # (1, 8)

    # Batch tiling: grid over B. When tiled (grid > 1) the batch tile must be a
    # multiple of 8 (sublane constraint); pad B up to a whole number of tiles.
    tb = min(block_b, B)
    if tb < B:
        tb = max(8, (tb // 8) * 8)
    n_blocks = pl.cdiv(B, tb)
    padded_B = n_blocks * tb
    if padded_B != B:
        x = jnp.pad(x, ((0, padded_B - B), (0, 0)))

    flat_args = [x, w1, b1, w2, b2, w3, b3, w4, b4, w5_row, b5]

    def weight_spec(arr):
        # Full-array block, constant block index -> stays VMEM-resident across
        # all grid steps (no per-step weight DMA). `arr` is bound as a function
        # argument here, so there is no late-binding hazard.
        return pl.BlockSpec(arr.shape, lambda i: (0, 0))

    in_specs = [pl.BlockSpec((tb, D), lambda i: (i, 0))]          # x: tiled on B
    in_specs += [weight_spec(a) for a in flat_args[1:]]           # params: resident
    out_spec = pl.BlockSpec((tb, 1), lambda i: (i, 0))

    # Scheduling hint for XLA.
    flops = 2 * padded_B * (D * 128 + 128 * 64 + 64 * 32 + 32 * 8 + 8 * 1)
    transcendentals = padded_B * (128 + 64 + 32 + 8)
    bytes_accessed = 4 * (x.size + padded_B
                          + sum(int(a.size) for a in flat_args[1:]))

    kernel = functools.partial(
        dqn_vrp_kernel,
        act_dtype=jnp.bfloat16 if bf16_activations else jnp.float32)

    out = pl.pallas_call(
        kernel,
        out_shape=jax.ShapeDtypeStruct((padded_B, 1), jnp.float32),
        grid=(n_blocks,),
        in_specs=in_specs,
        out_specs=out_spec,
        compiler_params=pltpu.CompilerParams(
            dimension_semantics=("parallel",)),   # megacore / dual-TC sharding
        cost_estimate=pl.CostEstimate(
            flops=flops,
            transcendentals=transcendentals,
            bytes_accessed=bytes_accessed),
    )(*flat_args)

    return out[:B]


def init_params(key, input_dim):
    """Deterministic init matching nn.Linear's U(-1/sqrt(fan_in), 1/sqrt(fan_in))."""
    dims = [input_dim, 128, 64, 32, 8, 1]
    params = {}
    for i in range(5):
        fan_in, fan_out = dims[i], dims[i + 1]
        key, kw, kb = jax.random.split(key, 3)
        bound = 1.0 / (fan_in ** 0.5)
        params[f"W{i + 1}"] = jax.random.uniform(
            kw, (fan_in, fan_out), jnp.float32, -bound, bound)
        params[f"b{i + 1}"] = jax.random.uniform(
            kb, (fan_out,), jnp.float32, -bound, bound)
    return params


def reference_forward(x, params):
    h = x
    for i in range(1, 5):
        h = jnp.tanh(jnp.dot(h, params[f"W{i}"],
                             precision=jax.lax.Precision.HIGHEST)
                     + params[f"b{i}"])
    return (jnp.dot(h, params["W5"], precision=jax.lax.Precision.HIGHEST)
            + params["b5"])


if __name__ == "__main__":
    key = jax.random.PRNGKey(0)
    key, kx = jax.random.split(key)

    batch = 8
    input_dim = 16  # small, module-consistent choice

    x = jax.random.normal(kx, (batch, input_dim), jnp.float32)
    params = init_params(key, input_dim)

    out = dqn_vrp_forward(x, params)
    out = jax.block_until_ready(out)

    ref = reference_forward(x, params)
    assert out.shape == (batch, 1)
    assert jnp.allclose(out, ref, atol=1e-4, rtol=1e-4), "mismatch vs reference"

    print("KERNEL_OK")
</pallas_src>

<mosaic_0001>
module attributes {stable_mosaic.version = 11 : i64} {
  func.func @dqn_vrp_kernel(%arg0: i32, %arg1: memref<8x16xf32, #tpu.memory_space<vmem>>, %arg2: memref<16x128xf32, #tpu.memory_space<vmem>>, %arg3: memref<1x128xf32, #tpu.memory_space<vmem>>, %arg4: memref<128x64xf32, #tpu.memory_space<vmem>>, %arg5: memref<1x64xf32, #tpu.memory_space<vmem>>, %arg6: memref<64x32xf32, #tpu.memory_space<vmem>>, %arg7: memref<1x32xf32, #tpu.memory_space<vmem>>, %arg8: memref<32x8xf32, #tpu.memory_space<vmem>>, %arg9: memref<1x8xf32, #tpu.memory_space<vmem>>, %arg10: memref<1x8xf32, #tpu.memory_space<vmem>>, %arg11: memref<1x1xf32, #tpu.memory_space<vmem>>, %arg12: memref<8x1xf32, #tpu.memory_space<vmem>>) attributes {dimension_semantics = [#tpu.dimension_semantics<parallel>], iteration_bounds = array<i64: 1>, scalar_prefetch = 0 : i64, scratch_operands = 0 : i64, tpu.core_type = #tpu.core_type<tc>, window_params = [{transform_indices = @transform_0, window_bounds = array<i64: 8, 16>}, {pipeline_mode = #tpu.pipeline_mode<synchronous>, transform_indices = @transform_1, window_bounds = array<i64: 16, 128>}, {pipeline_mode = #tpu.pipeline_mode<synchronous>, transform_indices = @transform_2, window_bounds = array<i64: 1, 128>}, {pipeline_mode = #tpu.pipeline_mode<synchronous>, transform_indices = @transform_3, window_bounds = array<i64: 128, 64>}, {pipeline_mode = #tpu.pipeline_mode<synchronous>, transform_indices = @transform_4, window_bounds = array<i64: 1, 64>}, {pipeline_mode = #tpu.pipeline_mode<synchronous>, transform_indices = @transform_5, window_bounds = array<i64: 64, 32>}, {pipeline_mode = #tpu.pipeline_mode<synchronous>, transform_indices = @transform_6, window_bounds = array<i64: 1, 32>}, {pipeline_mode = #tpu.pipeline_mode<synchronous>, transform_indices = @transform_7, window_bounds = array<i64: 32, 8>}, {pipeline_mode = #tpu.pipeline_mode<synchronous>, transform_indices = @transform_8, window_bounds = array<i64: 1, 8>}, {pipeline_mode = #tpu.pipeline_mode<synchronous>, transform_indices = @transform_9, window_bounds = array<i64: 1, 8>}, {pipeline_mode = #tpu.pipeline_mode<synchronous>, transform_indices = @transform_10, window_bounds = array<i64: 1, 1>}, {transform_indices = @transform_11, window_bounds = array<i64: 8, 1>}]} {
    %c0 = arith.constant 0 : index
    %c0_0 = arith.constant 0 : index
    %0 = vector.load %arg1[%c0, %c0_0] : memref<8x16xf32, #tpu.memory_space<vmem>>, vector<8x16xf32>
    %c0_1 = arith.constant 0 : index
    %c0_2 = arith.constant 0 : index
    %1 = vector.load %arg2[%c0_1, %c0_2] : memref<16x128xf32, #tpu.memory_space<vmem>>, vector<16x128xf32>
    %cst = arith.constant dense<0.000000e+00> : vector<8x128xf32>
    %2 = tpu.matmul %0, %1, %cst {dimension_numbers = #tpu.dot_dimension_numbers<[1], [0], [0], [1], [0, 0, 1, 1], [], []>} : vector<8x16xf32>, vector<16x128xf32>, vector<8x128xf32> -> vector<8x128xf32>
    %c0_3 = arith.constant 0 : index
    %c0_4 = arith.constant 0 : index
    %3 = vector.load %arg3[%c0_3, %c0_4] : memref<1x128xf32, #tpu.memory_space<vmem>>, vector<1x128xf32>
    %4 = vector.broadcast %3 : vector<1x128xf32> to vector<8x128xf32>
    %5 = arith.addf %2, %4 : vector<8x128xf32>
    %6 = math.tanh %5 : vector<8x128xf32>
    %c0_5 = arith.constant 0 : index
    %c0_6 = arith.constant 0 : index
    %7 = vector.load %arg4[%c0_5, %c0_6] : memref<128x64xf32, #tpu.memory_space<vmem>>, vector<128x64xf32>
    %cst_7 = arith.constant dense<0.000000e+00> : vector<8x64xf32>
    %8 = tpu.matmul %6, %7, %cst_7 {dimension_numbers = #tpu.dot_dimension_numbers<[1], [0], [0], [1], [0, 0, 1, 1], [], []>} : vector<8x128xf32>, vector<128x64xf32>, vector<8x64xf32> -> vector<8x64xf32>
    %c0_8 = arith.constant 0 : index
    %c0_9 = arith.constant 0 : index
    %9 = vector.load %arg5[%c0_8, %c0_9] : memref<1x64xf32, #tpu.memory_space<vmem>>, vector<1x64xf32>
    %10 = vector.broadcast %9 : vector<1x64xf32> to vector<8x64xf32>
    %11 = arith.addf %8, %10 : vector<8x64xf32>
    %12 = math.tanh %11 : vector<8x64xf32>
    %c0_10 = arith.constant 0 : index
    %c0_11 = arith.constant 0 : index
    %13 = vector.load %arg6[%c0_10, %c0_11] : memref<64x32xf32, #tpu.memory_space<vmem>>, vector<64x32xf32>
    %cst_12 = arith.constant dense<0.000000e+00> : vector<8x32xf32>
    %14 = tpu.matmul %12, %13, %cst_12 {dimension_numbers = #tpu.dot_dimension_numbers<[1], [0], [0], [1], [0, 0, 1, 1], [], []>} : vector<8x64xf32>, vector<64x32xf32>, vector<8x32xf32> -> vector<8x32xf32>
    %c0_13 = arith.constant 0 : index
    %c0_14 = arith.constant 0 : index
    %15 = vector.load %arg7[%c0_13, %c0_14] : memref<1x32xf32, #tpu.memory_space<vmem>>, vector<1x32xf32>
    %16 = vector.broadcast %15 : vector<1x32xf32> to vector<8x32xf32>
    %17 = arith.addf %14, %16 : vector<8x32xf32>
    %18 = math.tanh %17 : vector<8x32xf32>
    %c0_15 = arith.constant 0 : index
    %c0_16 = arith.constant 0 : index
    %19 = vector.load %arg8[%c0_15, %c0_16] : memref<32x8xf32, #tpu.memory_space<vmem>>, vector<32x8xf32>
    %cst_17 = arith.constant dense<0.000000e+00> : vector<8x8xf32>
    %20 = tpu.matmul %18, %19, %cst_17 {dimension_numbers = #tpu.dot_dimension_numbers<[1], [0], [0], [1], [0, 0, 1, 1], [], []>} : vector<8x32xf32>, vector<32x8xf32>, vector<8x8xf32> -> vector<8x8xf32>
    %c0_18 = arith.constant 0 : index
    %c0_19 = arith.constant 0 : index
    %21 = vector.load %arg9[%c0_18, %c0_19] : memref<1x8xf32, #tpu.memory_space<vmem>>, vector<1x8xf32>
    %22 = vector.broadcast %21 : vector<1x8xf32> to vector<8x8xf32>
    %23 = arith.addf %20, %22 : vector<8x8xf32>
    %24 = math.tanh %23 : vector<8x8xf32>
    %c0_20 = arith.constant 0 : index
    %c0_21 = arith.constant 0 : index
    %25 = vector.load %arg10[%c0_20, %c0_21] : memref<1x8xf32, #tpu.memory_space<vmem>>, vector<1x8xf32>
    %26 = vector.broadcast %25 : vector<1x8xf32> to vector<8x8xf32>
    %27 = arith.mulf %24, %26 : vector<8x8xf32>
    %cst_22 = arith.constant dense<0.000000e+00> : vector<8xf32>
    %28 = vector.multi_reduction <add>, %27, %cst_22 [1] : vector<8x8xf32> to vector<8xf32>
    %29 = vector.shape_cast %28 : vector<8xf32> to vector<8x1xf32>
    %c0_23 = arith.constant 0 : index
    %c0_24 = arith.constant 0 : index
    %30 = vector.load %arg11[%c0_23, %c0_24] : memref<1x1xf32, #tpu.memory_space<vmem>>, vector<1x1xf32>
    %31 = vector.broadcast %30 : vector<1x1xf32> to vector<8x1xf32>
    %32 = arith.addf %29, %31 : vector<8x1xf32>
    %c0_25 = arith.constant 0 : index
    %c0_26 = arith.constant 0 : index
    %33 = vector.load %arg12[%c0_25, %c0_26] : memref<8x1xf32, #tpu.memory_space<vmem>>, vector<8x1xf32>
    tpu.vector_store %arg12[%c0_25, %c0_26], %32 {strides = array<i32>} : memref<8x1xf32, #tpu.memory_space<vmem>>, vector<8x1xf32>,
    return
  }
  func.func @transform_0(%arg0: i32) -> (i32, i32) {
    %c0_i32 = arith.constant 0 : i32
    %c0_i32_0 = arith.constant 0 : i32
    return %arg0, %c0_i32 : i32, i32
  }
  func.func @transform_1(%arg0: i32) -> (i32, i32) {
    %c0_i32 = arith.constant 0 : i32
    %c0_i32_0 = arith.constant 0 : i32
    %c0_i32_1 = arith.constant 0 : i32
    return %c0_i32, %c0_i32_0 : i32, i32
  }
  func.func @transform_2(%arg0: i32) -> (i32, i32) {
    %c0_i32 = arith.constant 0 : i32
    %c0_i32_0 = arith.constant 0 : i32
    %c0_i32_1 = arith.constant 0 : i32
    return %c0_i32, %c0_i32_0 : i32, i32
  }
  func.func @transform_3(%arg0: i32) -> (i32, i32) {
    %c0_i32 = arith.constant 0 : i32
    %c0_i32_0 = arith.constant 0 : i32
    %c0_i32_1 = arith.constant 0 : i32
    return %c0_i32, %c0_i32_0 : i32, i32
  }
  func.func @transform_4(%arg0: i32) -> (i32, i32) {
    %c0_i32 = arith.constant 0 : i32
    %c0_i32_0 = arith.constant 0 : i32
    %c0_i32_1 = arith.constant 0 : i32
    return %c0_i32, %c0_i32_0 : i32, i32
  }
  func.func @transform_5(%arg0: i32) -> (i32, i32) {
    %c0_i32 = arith.constant 0 : i32
    %c0_i32_0 = arith.constant 0 : i32
    %c0_i32_1 = arith.constant 0 : i32
    return %c0_i32, %c0_i32_0 : i32, i32
  }
  func.func @transform_6(%arg0: i32) -> (i32, i32) {
    %c0_i32 = arith.constant 0 : i32
    %c0_i32_0 = arith.constant 0 : i32
    %c0_i32_1 = arith.constant 0 : i32
    return %c0_i32, %c0_i32_0 : i32, i32
  }
  func.func @transform_7(%arg0: i32) -> (i32, i32) {
    %c0_i32 = arith.constant 0 : i32
    %c0_i32_0 = arith.constant 0 : i32
    %c0_i32_1 = arith.constant 0 : i32
    return %c0_i32, %c0_i32_0 : i32, i32
  }
  func.func @transform_8(%arg0: i32) -> (i32, i32) {
    %c0_i32 = arith.constant 0 : i32
    %c0_i32_0 = arith.constant 0 : i32
    %c0_i32_1 = arith.constant 0 : i32
    return %c0_i32, %c0_i32_0 : i32, i32
  }
  func.func @transform_9(%arg0: i32) -> (i32, i32) {
    %c0_i32 = arith.constant 0 : i32
    %c0_i32_0 = arith.constant 0 : i32
    %c0_i32_1 = arith.constant 0 : i32
    return %c0_i32, %c0_i32_0 : i32, i32
  }
  func.func @transform_10(%arg0: i32) -> (i32, i32) {
    %c0_i32 = arith.constant 0 : i32
    %c0_i32_0 = arith.constant 0 : i32
    %c0_i32_1 = arith.constant 0 : i32
    return %c0_i32, %c0_i32_0 : i32, i32
  }
  func.func @transform_11(%arg0: i32) -> (i32, i32) {
    %c0_i32 = arith.constant 0 : i32
    %c0_i32_0 = arith.constant 0 : i32
    return %arg0, %c0_i32 : i32, i32
  }
}

</mosaic_0001>

<bundles_post_ra>
// kernel: tpu_custom_call.1
= control target key start
LH: loop header
LB: loop body
LE: loop exit
PB: predicated region body
PF: predicated region fallthrough
CT: control target
= control target key end

     0   :  { %vm47_vm0 = vcmask 130048   ;;  %vm125_vm1 = vcmask 523264   ;;  %vm158_vm2 = vcmask 261120   ;;  %vm188_vm3 = vcmask 64512   ;;  %s394_s1 = inlined_call_operand.vmem [shape: f32[16,128], index: 1, kind: input, shape index: {}]   ;;  %s395_s0 = inlined_call_operand.vmem [shape: f32[8,16], index: 0, kind: input, shape index: {}]   ;;  %s396_s3 = inlined_call_operand.vmem [shape: f32[128,64], index: 3, kind: input, shape index: {}]   ;;  %s397_s2 = inlined_call_operand.vmem [shape: f32[1,128], index: 2, kind: input, shape index: {}]   ;;  %s398_s4 = inlined_call_operand.vmem [shape: f32[1,64], index: 4, kind: input, shape index: {}]   ;;  %s399_s5 = inlined_call_operand.vmem [shape: f32[64,32], index: 5, kind: input, shape index: {}]   ;;  %s400_s6 = inlined_call_operand.vmem [shape: f32[1,32], index: 6, kind: input, shape index: {}]   ;;  %s401_s8 = inlined_call_operand.vmem [shape: f32[1,8], index: 8, kind: input, shape index: {}]   ;;  %s402_s7 = inlined_call_operand.vmem [shape: f32[32,8], index: 7, kind: input, shape index: {}]   ;;  %s403_s9 = inlined_call_operand.vmem [shape: f32[1,8], index: 9, kind: input, shape index: {}]   ;;  %s404_s10 = inlined_call_operand.<no memory space> [shape: f32[1,1], index: 10, kind: input, shape index: {}]   ;;  %s405_s11 = inlined_call_operand.vmem [shape: f32[8,1], index: 11, kind: output, shape index: {}]  }
   0x1   :  { %v42_v0 = vld [vmem:[%s394_s1 + $0x8] sm:$0xff]  ;;  %v41_v1 = vld [vmem:[%s394_s1] sm:$0xff]  ;;  %v87_v3 = vld [vmem:[%s396_s3 + $0x78] sm:$0xff]  ;;  %v16_v43 = vstv %s404_s10  ;;  %vm197_vm4 = vcmask 7168  }
   0x2   :  { %65 = vmatpush.msra.mxu0 %v42_v0  ;;  %v40_v2 = vld [vmem:[%s395_s0] sm:$0xff]  ;;  %v86_v4 = vld [vmem:[%s396_s3 + $0x70] sm:$0xff]  ;;  %92 = vmatpush.msra.mxu1 %v87_v3  ;;  %v85_v5 = vld [vmem:[%s396_s3 + $0x68] sm:$0xff]  ;;  %17 = vst [vmem:[#allocation2] sm:$0x1] %v16_v43 }
   0x3   :  { %v84_v6 = vld [vmem:[%s396_s3 + $0x60] sm:$0xff]  ;;  %v83_v7 = vld [vmem:[%s396_s3 + $0x58] sm:$0xff]  ;;  %v82_v8 = vld [vmem:[%s396_s3 + $0x50] sm:$0xff] }
   0x4   :  { %66 = vmatpush.msra.mxu0 %v41_v1  ;;  %93 = vmatpush.msra.mxu1 %v86_v4  ;;  %v81_v9 = vld [vmem:[%s396_s3 + $0x48] sm:$0xff]  ;;  %v80_v10 = vld [vmem:[%s396_s3 + $0x40] sm:$0xff]  ;;  %v79_v11 = vld [vmem:[%s396_s3 + $0x38] sm:$0xff] }
   0x5   :  { %203 = vmatmul.msk.f32.vlgmr.msra.gmra.mxu0 %vm47_vm0, %v40_v2  ;;  %v78_v12 = vld [vmem:[%s396_s3 + $0x30] sm:$0xff]  ;;  %v77_v13 = vld [vmem:[%s396_s3 + $0x28] sm:$0xff]  ;;  %v76_v14 = vld [vmem:[%s396_s3 + $0x20] sm:$0xff] }
   0x6   :  { %94 = vmatpush.msra.mxu1 %v85_v5  ;;  %v75_v15 = vld [vmem:[%s396_s3 + $0x18] sm:$0xff]  ;;  %v74_v16 = vld [vmem:[%s396_s3 + $0x10] sm:$0xff]  ;;  %v73_v17 = vld [vmem:[%s396_s3 + $0x8] sm:$0xff] }
   0x7   :  { %v72_v18 = vld [vmem:[%s396_s3] sm:$0xff]  ;;  %v120_v19 = vld [vmem:[%s399_s5 + $0x38] sm:$0xff]  ;;  %v119_v20 = vld [vmem:[%s399_s5 + $0x30] sm:$0xff] }
   0x8   :  { %95 = vmatpush.msra.mxu1 %v84_v6  ;;  %137 = vmatpush.msra.mxu2 %v120_v19  ;;  %v118_v21 = vld [vmem:[%s399_s5 + $0x28] sm:$0xff]  ;;  %v206_v22 = vld [vmem:[%s397_s2] ss:$0 sm:$0xff]  ;;  %v116_v27 = vld [vmem:[%s399_s5 + $0x18] sm:$0xff] }
   0x9   :  { %v117_v26 = vld [vmem:[%s399_s5 + $0x20] sm:$0xff]  ;;  %v115_v28 = vld [vmem:[%s399_s5 + $0x10] sm:$0xff]  ;;  %v114_v29 = vld [vmem:[%s399_s5 + $0x8] sm:$0xff] }
   0xa   :  { %96 = vmatpush.msra.mxu1 %v83_v7  ;;  %138 = vmatpush.msra.mxu2 %v119_v20  ;;  %v113_v30 = vld [vmem:[%s399_s5] sm:$0xff]  ;;  %v153_v35 = vld [vmem:[%s402_s7 + $0x18] sm:$0xff]  ;;  %v152_v36 = vld [vmem:[%s402_s7 + $0x10] sm:$0xff] }
   0xb   :  { %v207_v31 = vld [vmem:[%s398_s4] ss:$0 sm:$0xff]  ;;  %174 = vmatpush.msra.mxu3 %v153_v35  ;;  %v151_v37 = vld [vmem:[%s402_s7 + $0x8] sm:$0xff] }
   0xc   :  { %97 = vmatpush.msra.mxu1 %v82_v8  ;;  %139 = vmatpush.msra.mxu2 %v118_v21  ;;  %v150_v38 = vld [vmem:[%s402_s7] sm:$0xff] }
   0xd   :  { %175 = vmatpush.msra.mxu3 %v152_v36  ;;  %v208_v39 = vld [vmem:[%s400_s6] ss:$0 sm:$0xff] }
   0xe   :  { %98 = vmatpush.msra.mxu1 %v81_v9  ;;  %140 = vmatpush.msra.mxu2 %v117_v26  ;;  %v209_v44 = vld [vmem:[%s401_s8] ss:$0 sm:$0xff] }
   0xf   :  { %176 = vmatpush.msra.mxu3 %v151_v37  ;;  %v210_v47 = vld [vmem:[%s403_s9] ss:$0 sm:$0xff] }
  0x10   :  { %99 = vmatpush.msra.mxu1 %v80_v10  ;;  %141 = vmatpush.msra.mxu2 %v116_v27  ;;  %v211_v51 = vld [vmem:[#allocation2] ss:$0 sm:$0xff] }
  0x11   :  { %177 = vmatpush.msra.mxu3 %v150_v38 }
  0x12   :  { %100 = vmatpush.msra.mxu1 %v79_v11  ;;  %142 = vmatpush.msra.mxu2 %v115_v28 }
  0x14   :  { %101 = vmatpush.msra.mxu1 %v78_v12  ;;  %143 = vmatpush.msra.mxu2 %v114_v29 }
  0x16   :  { %102 = vmatpush.msra.mxu1 %v77_v13  ;;  %144 = vmatpush.msra.mxu2 %v113_v30 }
  0x18   :  { %103 = vmatpush.msra.mxu1 %v76_v14 }
  0x1a   :  { %104 = vmatpush.msra.mxu1 %v75_v15 }
  0x1c   :  { %105 = vmatpush.msra.mxu1 %v74_v16 }
  0x1e   :  { %106 = vmatpush.msra.mxu1 %v73_v17 }
  0x20   :  { %107 = vmatpush.msra.mxu1 %v72_v18 }
  0x82   :  { %v68_v23 = vpop.f32.mrf.mxu0 }
  0x83   :  { %v69_v24 = vadd.f32 %v206_v22, %v68_v23 }
  0x85   :  { %212 = vtanh.f32 %v69_v24 }
  0x8b   :  { %v213_v25 = vpop.eup %212 }
  0x8c   :  { %108 = vmatmul.f32.vlgmr.msra.gmra.mxu1 %v213_v25 }
 0x109   :  { %v109_v32 = vpop.f32.mrf.mxu1 }
 0x10a   :  { %v110_v33 = vadd.f32 %v207_v31, %v109_v32 }
 0x10c   :  { %214 = vtanh.f32 %v110_v33 }
 0x112   :  { %v215_v34 = vpop.eup %214 }
 0x113   :  { %204 = vmatmul.msk.f32.vlgmr.msra.gmra.mxu2 %vm125_vm1, %v215_v34 }
 0x196   :  { %v146_v40 = vpop.f32.mrf.mxu2 }
 0x197   :  { %v147_v41 = vadd.f32 %v208_v39, %v146_v40 }
 0x199   :  { %216 = vtanh.f32 %v147_v41 }
 0x19f   :  { %v217_v42 = vpop.eup %216 }
 0x1a0   :  { %205 = vmatmul.msk.f32.vlgmr.msra.gmra.mxu3 %vm158_vm2, %v217_v42 }
 0x223   :  { %v179_v45 = vpop.f32.mrf.mxu3 }
 0x224   :  { %v180_v46 = vadd.f32 %v209_v44, %v179_v45 }
 0x226   :  { %218 = vtanh.f32 %v180_v46 }
 0x22c   :  { %v219_v48 = vpop.eup %218 }
 0x22d   :  { %v187_v49 = vmul.f32 %v219_v48, %v210_v47 }
 0x22f   :  { %v189_v50 = vsel %vm188_vm3, %v187_v49, 0.0 }
 0x230   :  { %190 = vadd.xlane.f32.xlu0 %v189_v50 }
 0x2a3   :  { %v191_v52 = vpop.xlane.xlu0 %190 }
 0x2a4   :  { %v196_v53 = vadd.f32 %v211_v51, %v191_v52 }
 0x2a6   :  { %198 = vst.msk [vmem:[%s405_s11] sm:$0xff] %vm197_vm4, %v196_v53 }

</bundles_post_ra>
